<compile_context>
chip_gen: v7x
topology: tpu7x:2x2x1
jax: 0.10.0
libtpu: 0.0.40
codegen_flags: <defaults>
</compile_context>

<pallas_src>
import functools

import jax
import jax.numpy as jnp
from jax import lax
from jax.experimental import pallas as pl
from jax.experimental.pallas import tpu as pltpu

N_CLASSES = 4        # the module hard-codes nn.Linear(embed_size, 4)
N_PAD = 128          # lane-dense padded width for weight columns / logits


def _head_kernel(x_ref, w_ref, b_ref, o_ref, acc_ref, *, inv_c, tok_tile,
                 n_tokens, mask_tokens):
    """Grid = (batch tiles, token tiles); token axis is the reduction axis.

    x_ref  : (TB, TC, E)  input tile (native dtype)
    w_ref  : (E, N_PAD)   zero-padded weight, resident across the grid
    b_ref  : (1, N_PAD)   zero-padded bias, resident across the grid
    o_ref  : (TB, 4)      log-probs for this batch tile
    acc_ref: (TB, E) f32  running token-sum accumulator (VMEM scratch)
    """
    k = pl.program_id(1)

    @pl.when(k == 0)
    def _():
        acc_ref[...] = jnp.zeros_like(acc_ref)

    x = x_ref[...]                                           # (TB, TC, E)
    if mask_tokens:
        # Partial last token tile: zero out rows beyond the true sequence end.
        tok = lax.broadcasted_iota(jnp.int32, (1, tok_tile, 1), 1)
        valid = (k * tok_tile + tok) < n_tokens
        x = jnp.where(valid, x, 0)
    # f32 accumulation of the token sum regardless of the input dtype
    # (avoids an explicit full-block astype copy).
    acc_ref[...] += jnp.sum(x, axis=1, dtype=jnp.float32)    # (TB, E)

    # Epilogue only on the last token tile of this batch tile.
    @pl.when(k == pl.num_programs(1) - 1)
    def _():
        pooled = acc_ref[...] * inv_c                        # mean over tokens
        logits = jnp.dot(pooled, w_ref[...],
                         preferred_element_type=jnp.float32) + b_ref[...]
        # Mask the zero-padded columns so they do not enter the softmax.
        col = lax.broadcasted_iota(jnp.int32, logits.shape, 1)
        logits = jnp.where(col < N_CLASSES, logits, -jnp.inf)
        m = jnp.max(logits, axis=-1, keepdims=True)
        shifted = logits - m
        lse = jnp.log(jnp.sum(jnp.exp(shifted), axis=-1, keepdims=True))
        o_ref[...] = (shifted - lse)[:, :N_CLASSES].astype(o_ref.dtype)


def _vmem_capacity_bytes():
    try:
        return int(pltpu.get_tpu_info().vmem_capacity_bytes)
    except Exception:
        return 64 << 20          # conservative fallback: v7x per-TC VMEM


def _budgets():
    """Returns (x-block VMEM budget incl. double-buffer/upcast, vmem ceiling)."""
    cap = _vmem_capacity_bytes()
    if cap >= (96 << 20):        # v5e / v6e: 128 MiB VMEM
        return 48 << 20, cap - (24 << 20)
    # v7x: 64 MiB VMEM per TensorCore -> leave explicit headroom
    return 32 << 20, 56 << 20


def _pick_tiles(B, C, E, itemsize, x_budget):
    """Token tile first (prefer the full, contiguous token axis), then the
    batch tile fills the remaining budget, capped so v7x megacore sees >= 2
    (ideally >= 4) batch tiles along the parallel grid axis."""
    # Sub-32-bit dtypes pack along sublanes: bf16 tiles of 16, 8-bit of 32.
    pack = {1: 32, 2: 16}.get(itemsize, 8)
    # Bytes per x-block element actually resident in VMEM: double-buffered
    # native input + a possible f32 upcast temporary for sub-f32 inputs.
    per_elem = 2 * itemsize + (4 if itemsize < 4 else 0)

    tb_min = 8 if B % 8 == 0 else B

    # ---- token tile: prefer TC = C (one contiguous HBM slab per block) ----
    if tb_min * C * E * per_elem <= x_budget or C <= pack:
        TC = C
    else:
        max_tc = x_budget // (tb_min * E * per_elem)
        max_tc = max(pack, (min(max_tc, C) // pack) * pack)
        # Prefer an exact divisor of C (no masked partial tile) when a
        # reasonably large one exists; otherwise take a partial last tile.
        best_div = 0
        tc = pack
        while tc <= max_tc:
            if C % tc == 0:
                best_div = tc
            tc += pack
        TC = best_div if best_div * 2 >= max_tc else max_tc

    # ---- batch tile: fill the remaining budget ----
    if B % 8 != 0:
        return B, TC
    max_tb = max(8, min(B, x_budget // (TC * E * per_elem)))
    # Megacore (v7x): keep >= 2 (ideally >= 4) batch tiles so the "parallel"
    # grid axis can be sharded across TensorCores; harmless on 1-TC chips.
    if B % 32 == 0:
        max_tb = min(max_tb, max(B // 4, 8))
    elif B % 16 == 0:
        max_tb = min(max_tb, max(B // 2, 8))
    TB = 8
    tb = 16
    while tb <= max_tb:
        if B % tb == 0:
            TB = tb
        tb += 8
    return TB, TC


def transformer_classification_head(x, w, b):
    """x: (B, C, E), w: (E, 4), b: (4,)  ->  (B, 4) float32 log-probs."""
    B, C, E = x.shape
    itemsize = jnp.dtype(x.dtype).itemsize

    x_budget, vmem_cap = _budgets()
    TB, TC = _pick_tiles(B, C, E, itemsize, x_budget)
    grid = (B // TB, pl.cdiv(C, TC))
    mask_tokens = (C % TC) != 0

    # Zero-pad the tiny (E, 4) weight / (4,) bias out to 128 lanes so the
    # logits are lane-dense; padded columns are -inf masked in-kernel.
    w_pad = jnp.zeros((E, N_PAD), jnp.float32).at[:, :N_CLASSES].set(
        w.astype(jnp.float32))
    b_pad = jnp.zeros((1, N_PAD), jnp.float32).at[0, :N_CLASSES].set(
        b.astype(jnp.float32))

    x_block = TB * TC * E
    resident_bytes = (2 * x_block * itemsize                   # dbl-buffered x
                      + (x_block * 4 if itemsize < 4 else 0)   # f32 upcast temp
                      + 2 * E * N_PAD * 4                      # weight buffers
                      + 2 * N_PAD * 4                          # bias buffers
                      + TB * E * 4                             # accumulator
                      + 2 * TB * N_PAD * 4)                    # output (padded)
    vmem_limit = int(max(32 << 20, min(resident_bytes + (8 << 20), vmem_cap)))

    cost = pl.CostEstimate(
        flops=2 * B * C * E + 2 * B * E * N_PAD,
        transcendentals=B * (N_CLASSES + 1),
        bytes_accessed=B * C * E * itemsize + E * N_PAD * 4 + B * N_CLASSES * 4,
    )

    kernel = functools.partial(_head_kernel, inv_c=1.0 / C, tok_tile=TC,
                               n_tokens=C, mask_tokens=mask_tokens)

    return pl.pallas_call(
        kernel,
        out_shape=jax.ShapeDtypeStruct((B, N_CLASSES), jnp.float32),
        grid_spec=pltpu.PrefetchScalarGridSpec(
            num_scalar_prefetch=0,
            grid=grid,
            in_specs=[
                pl.BlockSpec((TB, TC, E), lambda i, k: (i, k, 0)),
                # Constant index maps -> weight / bias stay resident across the
                # whole grid (default double-buffering kept for robustness).
                pl.BlockSpec((E, N_PAD), lambda i, k: (0, 0)),
                pl.BlockSpec((1, N_PAD), lambda i, k: (0, 0)),
            ],
            out_specs=pl.BlockSpec((TB, N_CLASSES), lambda i, k: (i, 0)),
            scratch_shapes=[pltpu.VMEM((TB, E), jnp.float32)],
        ),
        compiler_params=pltpu.CompilerParams(
            dimension_semantics=("parallel", "arbitrary"),
            vmem_limit_bytes=vmem_limit,
        ),
        cost_estimate=cost,
    )(x, w_pad, b_pad)


def _reference(x, w, b):
    pooled = jnp.mean(x.astype(jnp.float32), axis=1)
    logits = pooled @ w + b
    return jax.nn.log_softmax(logits, axis=-1)


if __name__ == "__main__":
    key = jax.random.PRNGKey(0)
    k_x, k_w, k_b = jax.random.split(key, 3)

    batch, seq, embed = 2, 8, 32     # b, c, e
    n_out = N_CLASSES                # module hard-codes Linear(embed_size, 4)

    x = jax.random.normal(k_x, (batch, seq, embed), dtype=jnp.float32)

    # Deterministic Linear init (uniform in +-1/sqrt(embed), like torch default)
    bound = 1.0 / (embed ** 0.5)
    w = jax.random.uniform(k_w, (embed, n_out), jnp.float32, -bound, bound)
    b = jax.random.uniform(k_b, (n_out,), jnp.float32, -bound, bound)

    out = transformer_classification_head(x, w, b)
    out = jax.block_until_ready(out)

    ref = _reference(x, w, b)
    assert out.shape == (batch, n_out)
    assert jnp.allclose(out, ref, atol=1e-5, rtol=1e-5), "mismatch vs reference"

    print("KERNEL_OK")
</pallas_src>

<mosaic_0001>
module attributes {stable_mosaic.version = 11 : i64} {
  func.func @_head_kernel(%arg0: i32, %arg1: i32, %arg2: memref<2x8x32xf32, #tpu.memory_space<vmem>>, %arg3: memref<32x128xf32, #tpu.memory_space<vmem>>, %arg4: memref<1x128xf32, #tpu.memory_space<vmem>>, %arg5: memref<2x4xf32, #tpu.memory_space<vmem>>, %arg6: memref<2x32xf32, #tpu.memory_space<vmem>>) attributes {dimension_semantics = [#tpu.dimension_semantics<parallel>, #tpu.dimension_semantics<arbitrary>], iteration_bounds = array<i64: 1, 1>, scalar_prefetch = 0 : i64, scratch_operands = 1 : i64, tpu.core_type = #tpu.core_type<tc>, window_params = [{transform_indices = @transform_0, window_bounds = array<i64: 2, 8, 32>}, {pipeline_mode = #tpu.pipeline_mode<synchronous>, transform_indices = @transform_1, window_bounds = array<i64: 32, 128>}, {pipeline_mode = #tpu.pipeline_mode<synchronous>, transform_indices = @transform_2, window_bounds = array<i64: 1, 128>}, {transform_indices = @transform_3, window_bounds = array<i64: 2, 4>}]} {
    %c0_i32 = arith.constant 0 : i32
    %0 = arith.cmpi eq, %arg1, %c0_i32 : i32
    %1 = arith.extui %0 : i1 to i32
    %c0_i32_0 = arith.constant 0 : i32
    %2 = arith.cmpi ne, %1, %c0_i32_0 : i32
    scf.if %2 {
      %cst_9 = arith.constant 0.000000e+00 : f32
      %11 = vector.broadcast %cst_9 : f32 to vector<2x32xf32>
      %c0_10 = arith.constant 0 : index
      %c0_11 = arith.constant 0 : index
      %12 = vector.load %arg6[%c0_10, %c0_11] : memref<2x32xf32, #tpu.memory_space<vmem>>, vector<2x32xf32>
      tpu.vector_store %arg6[%c0_10, %c0_11], %11 {strides = array<i32>} : memref<2x32xf32, #tpu.memory_space<vmem>>, vector<2x32xf32>,
    } else {
    }
    %c0 = arith.constant 0 : index
    %c0_1 = arith.constant 0 : index
    %c0_2 = arith.constant 0 : index
    %3 = vector.load %arg2[%c0, %c0_1, %c0_2] : memref<2x8x32xf32, #tpu.memory_space<vmem>>, vector<2x8x32xf32>
    %c0_3 = arith.constant 0 : index
    %c0_4 = arith.constant 0 : index
    %4 = vector.load %arg6[%c0_3, %c0_4] : memref<2x32xf32, #tpu.memory_space<vmem>>, vector<2x32xf32>
    %cst = arith.constant dense<0.000000e+00> : vector<2x32xf32>
    %5 = vector.multi_reduction <add>, %3, %cst [1] : vector<2x8x32xf32> to vector<2x32xf32>
    %6 = arith.addf %4, %5 : vector<2x32xf32>
    %c0_5 = arith.constant 0 : index
    %c0_6 = arith.constant 0 : index
    %7 = vector.load %arg6[%c0_5, %c0_6] : memref<2x32xf32, #tpu.memory_space<vmem>>, vector<2x32xf32>
    tpu.vector_store %arg6[%c0_5, %c0_6], %6 {strides = array<i32>} : memref<2x32xf32, #tpu.memory_space<vmem>>, vector<2x32xf32>,
    %c0_i32_7 = arith.constant 0 : i32
    %8 = arith.cmpi eq, %arg1, %c0_i32_7 : i32
    %9 = arith.extui %8 : i1 to i32
    %c0_i32_8 = arith.constant 0 : i32
    %10 = arith.cmpi ne, %9, %c0_i32_8 : i32
    scf.if %10 {
      %c0_9 = arith.constant 0 : index
      %c0_10 = arith.constant 0 : index
      %11 = vector.load %arg6[%c0_9, %c0_10] : memref<2x32xf32, #tpu.memory_space<vmem>>, vector<2x32xf32>
      %cst_11 = arith.constant 1.250000e-01 : f32
      %12 = vector.broadcast %cst_11 : f32 to vector<2x32xf32>
      %13 = arith.mulf %11, %12 : vector<2x32xf32>
      %c0_12 = arith.constant 0 : index
      %c0_13 = arith.constant 0 : index
      %14 = vector.load %arg3[%c0_12, %c0_13] : memref<32x128xf32, #tpu.memory_space<vmem>>, vector<32x128xf32>
      %cst_14 = arith.constant dense<0.000000e+00> : vector<2x128xf32>
      %15 = tpu.matmul %13, %14, %cst_14 {dimension_numbers = #tpu.dot_dimension_numbers<[1], [0], [0], [1], [0, 0, 1, 1], [], []>} : vector<2x32xf32>, vector<32x128xf32>, vector<2x128xf32> -> vector<2x128xf32>
      %c0_15 = arith.constant 0 : index
      %c0_16 = arith.constant 0 : index
      %16 = vector.load %arg4[%c0_15, %c0_16] : memref<1x128xf32, #tpu.memory_space<vmem>>, vector<1x128xf32>
      %17 = vector.broadcast %16 : vector<1x128xf32> to vector<2x128xf32>
      %18 = arith.addf %15, %17 : vector<2x128xf32>
      %19 = tpu.iota {dimensions = array<i32: 1>} : vector<2x128xi32>
      %c4_i32 = arith.constant 4 : i32
      %20 = vector.broadcast %c4_i32 : i32 to vector<2x128xi32>
      %21 = arith.cmpi slt, %19, %20 : vector<2x128xi32>
      %cst_17 = arith.constant 0xFF800000 : f32
      %22 = vector.broadcast %cst_17 : f32 to vector<2x128xf32>
      %23 = arith.select %21, %18, %22 : vector<2x128xi1>, vector<2x128xf32>
      %cst_18 = arith.constant dense<0xFF800000> : vector<2xf32>
      %24 = vector.multi_reduction <maximumf>, %23, %cst_18 [1] : vector<2x128xf32> to vector<2xf32>
      %25 = vector.shape_cast %24 : vector<2xf32> to vector<2x1xf32>
      %26 = vector.broadcast %25 : vector<2x1xf32> to vector<2x128xf32>
      %27 = arith.subf %23, %26 : vector<2x128xf32>
      %28 = math.exp %27 : vector<2x128xf32>
      %cst_19 = arith.constant dense<0.000000e+00> : vector<2xf32>
      %29 = vector.multi_reduction <add>, %28, %cst_19 [1] : vector<2x128xf32> to vector<2xf32>
      %30 = vector.shape_cast %29 : vector<2xf32> to vector<2x1xf32>
      %31 = math.log %30 : vector<2x1xf32>
      %32 = vector.broadcast %31 : vector<2x1xf32> to vector<2x128xf32>
      %33 = arith.subf %27, %32 : vector<2x128xf32>
      %34 = vector.extract_strided_slice %33 {offsets = [0, 0], sizes = [2, 4], strides = [1, 1]} : vector<2x128xf32> to vector<2x4xf32>
      %c0_20 = arith.constant 0 : index
      %c0_21 = arith.constant 0 : index
      %35 = vector.load %arg5[%c0_20, %c0_21] : memref<2x4xf32, #tpu.memory_space<vmem>>, vector<2x4xf32>
      tpu.vector_store %arg5[%c0_20, %c0_21], %34 {strides = array<i32>} : memref<2x4xf32, #tpu.memory_space<vmem>>, vector<2x4xf32>,
    } else {
    }
    return
  }
  func.func @transform_0(%arg0: i32, %arg1: i32) -> (i32, i32, i32) {
    %c0_i32 = arith.constant 0 : i32
    %c0_i32_0 = arith.constant 0 : i32
    return %arg0, %arg1, %c0_i32 : i32, i32, i32
  }
  func.func @transform_1(%arg0: i32, %arg1: i32) -> (i32, i32) {
    %c0_i32 = arith.constant 0 : i32
    %c0_i32_0 = arith.constant 0 : i32
    %c0_i32_1 = arith.constant 0 : i32
    return %c0_i32, %c0_i32_0 : i32, i32
  }
  func.func @transform_2(%arg0: i32, %arg1: i32) -> (i32, i32) {
    %c0_i32 = arith.constant 0 : i32
    %c0_i32_0 = arith.constant 0 : i32
    %c0_i32_1 = arith.constant 0 : i32
    return %c0_i32, %c0_i32_0 : i32, i32
  }
  func.func @transform_3(%arg0: i32, %arg1: i32) -> (i32, i32) {
    %c0_i32 = arith.constant 0 : i32
    %c0_i32_0 = arith.constant 0 : i32
    return %arg0, %c0_i32 : i32, i32
  }
}

</mosaic_0001>

<bundles_post_ra>
// kernel: tpu_custom_call.1
= control target key start
LH: loop header
LB: loop body
LE: loop exit
PB: predicated region body
PF: predicated region fallthrough
CT: control target
= control target key end

     0   :  { %8 = vsyncpa [#allocation4], 0  ;;  %s379_s0 = inlined_call_operand.hbm [shape: f32[2,8,32], index: 0, kind: input, shape index: {}]   ;;  %s380_s1 = inlined_call_operand.hbm [shape: f32[32,128], index: 1, kind: input, shape index: {}]   ;;  %s381_s2 = inlined_call_operand.vmem [shape: f32[1,128], index: 2, kind: input, shape index: {}]   ;;  %s382_s3 = inlined_call_operand.hbm [shape: f32[2,4], index: 3, kind: output, shape index: {}]  }
   0x1   :  { %9 = vsyncpa [#allocation7], 0 }
   0x2   :  { %10 = vsyncpa [#allocation5], 0  ;;  %s307_s12 = smov [#allocation3]   ;;  %s235_s16 = scalar_lea.hbm %s379_s0, 256 }
   0x3   :  { %s16_s13 = sshll.u32 %s307_s12, 4  ;;  %p236_p0 = scmp.ne.s32.totalorder %s379_s0, %s235_s16  ;;  %s17_s13 = int_to_ptr.vmem [resolvable:$true] %s16_s13 }
   0x4   :  { %p239_p1 = scmp.lt.u32.totalorder %s235_s16, %s379_s0 }
   0x6   :  { %p241_p2 = pnand %p239_p1, %p236_p0 }
   0x8   :  { %244 = shalt.err (!%p241_p2)
}
   0x9   :  { %s245_s21 = scalar_lea.vmem %s17_s13, 256  ;;  %p250_p4 = scmp.lt.s32.totalorder %s17_s13, %s17_s13 }
   0xa   :  { %p246_p3 = scmp.ne.s32.totalorder %s17_s13, %s245_s21  ;;  %p251_p5 = scmp.lt.s32.totalorder %s245_s21, %s245_s21 }
   0xc   :  { %p252_p6 = por %p251_p5, %p250_p4 }
   0xe   :  { %p253_p7 = pnand %p252_p6, %p246_p3 }
  0x10   :  { %256 = shalt.err (!%p253_p7)
}
  0x11   :  { %s308_s22 = smov 128   ;;  %s309_s23 = smov 8  }
  0x12   :  { %22 = dma.hbm_to_vmem [thread:$0]  %s379_s0, 256, %s17_s13, [#allocation4], %s308_s22, %s308_s22, %s309_s23  }
  0x13   :  { %s310_s26 = smov [#allocation6]   ;;  %s257_s30 = scalar_lea.hbm %s380_s1, 512 }
  0x14   :  { %s28_s27 = sshll.u32 %s310_s26, 4  ;;  %p258_p8 = scmp.ne.s32.totalorder %s380_s1, %s257_s30  ;;  %s29_s27 = int_to_ptr.vmem [resolvable:$true] %s28_s27 }
  0x15   :  { %p261_p9 = scmp.lt.u32.totalorder %s257_s30, %s380_s1 }
  0x17   :  { %p263_p10 = pnand %p261_p9, %p258_p8 }
  0x19   :  { %266 = shalt.err (!%p263_p10)
}
  0x1a   :  { %s267_s8 = scalar_lea.vmem %s29_s27, 512  ;;  %p272_p12 = scmp.lt.s32.totalorder %s29_s27, %s29_s27 }
  0x1b   :  { %p268_p11 = scmp.ne.s32.totalorder %s29_s27, %s267_s8  ;;  %p273_p13 = scmp.lt.s32.totalorder %s267_s8, %s267_s8 }
  0x1d   :  { %p274_p0 = por %p273_p13, %p272_p12 }
  0x1f   :  { %p275_p1 = pnand %p274_p0, %p268_p11 }
  0x21   :  { %278 = shalt.err (!%p275_p1)
}
  0x22   :  { %34 = dma.hbm_to_vmem [thread:$0]  %s380_s1, 512, %s29_s27, [#allocation7], %s308_s22, %s308_s22, %s309_s23  }
  0x23   :  { %301 = dma.done.wait [#allocation4], 256  }
  0x24   :  { %302 = vsyncadd [#allocation4], 4294967040 }
  0x25   :  { %303 = dma.done.wait [#allocation7], 512  }
  0x26   :  { %304 = vsyncadd [#allocation7], 4294966784  ;;  %vm47_vm0 = vcmask 254976   ;;  %v311_v0 = vmov 0.0|0.0   ;;  %v312_v1 = vmov 0.0   ;;  %vm313_vm1 = vmmov 0  }
  0x27   :  { %217 = vmatprep.subr.bf16.mxu0 %v311_v0  ;;  %48 = vst.msk [vmem:[#allocation2] sm:$0x3] %vm47_vm0, %v312_v1  ;;  %214 = vmatprep.mubr.msk.f32.mxu0 %vm313_vm1, %v312_v1  ;;  %vm52_vm2 = vcmask 261120   ;;  %v80_v2 = vld [vmem:[#allocation6] sm:$0xff]  ;;  %v81_v3 = vld [vmem:[#allocation6 + $0x8] sm:$0xff]  ;;  %v82_v4 = vld [vmem:[#allocation6 + $0x10] sm:$0xff]  ;;  %v164_v29 = vlaneseq }
  0x28   :  { %v218_v5 = vpack.c.bf16 %v81_v3, %v80_v2  ;;  %v83_v6 = vld [vmem:[#allocation6 + $0x18] sm:$0xff]  ;;  %v49_v7 = vld [vmem:[#allocation3] sm:$0xff]  ;;  %vm69_vm3 = vcmask 1041409   ;;  %v199_v31 = vld [vmem:[%s381_s2] ss:$0 sm:$0xff]  ;;  %vm168_vm5 = vcmask 1041408  }
  0x29   :  { %v50_v8 = vld [vmem:[#allocation3 + $0x8] sm:$0xff]  ;;  %v53_v9 = vsel %vm52_vm2, %v49_v7, 0.0  ;;  %v221_v11 = vpack.c.bf16 %v83_v6, %v82_v4  ;;  %v165_v30 = vand.u32 127, %v164_v29  ;;  %s314_s11 = smov [#allocation8]   ;;  %vm181_vm6 = vcmask 25600  }
  0x2a   :  { %v60_v10 = vsel %vm52_vm2, %v50_v8, 0.0  ;;  %219 = vmatpush3.bf16.msra.mxu0 %v218_v5  ;;  %v54_v12 = vrot.slane %v53_v9, 4  ;;  %s189_s2 = sshll.u32 %s314_s11, 4  ;;  %s190_s2 = int_to_ptr.vmem [resolvable:$true] %s189_s2 }
  0x2b   :  { %v61_v13 = vrot.slane %v60_v10, 4  ;;  %220 = vmatprep.subr.bf16.mxu0 %v311_v0  ;;  %vm166_vm4 = vcmp.lt.s32.totalorder %v165_v30, 4  ;;  %s279_s12 = scalar_lea.vmem %s190_s2, 32  ;;  %p284_p3 = scmp.lt.s32.totalorder %s190_s2, %s190_s2 }
  0x2c   :  { %v55_v14 = vadd.f32 %v54_v12, %v53_v9  ;;  %p280_p2 = scmp.ne.s32.totalorder %s190_s2, %s279_s12  ;;  %p285_p4 = scmp.lt.s32.totalorder %s279_s12, %s279_s12 }
  0x2d   :  { %v62_v15 = vadd.f32 %v61_v13, %v60_v10 }
  0x2e   :  { %222 = vmatpush3.bf16.msra.mxu0 %v221_v11  ;;  %v56_v16 = vrot.slane %v55_v14, 2  ;;  %v51_v22 = vld [vmem:[#allocation2] sm:$0x3]  ;;  %p286_p5 = por %p285_p4, %p284_p3 }
  0x2f   :  { %v63_v17 = vrot.slane %v62_v15, 2 }
  0x30   :  { %v57_v18 = vadd.f32 %v56_v16, %v55_v14  ;;  %p287_p6 = pnand %p286_p5, %p280_p2 }
  0x31   :  { %v64_v19 = vadd.f32 %v63_v17, %v62_v15 }
  0x32   :  { %v58_v20 = vrot.slane %v57_v18, 1 }
  0x33   :  { %v65_v21 = vrot.slane %v64_v19, 1 }
  0x34   :  { %v59_v23 = vadd.f32 %v58_v20, %v57_v18 }
  0x35   :  { %v66_v24 = vadd.f32 %v65_v21, %v64_v19 }
  0x37   :  { %v70_v25 = vsel %vm69_vm3, %v66_v24, %v59_v23 }
  0x38   :  { %v72_v26 = vadd.f32 %v70_v25, %v51_v22 }
  0x3a   :  { %74 = vst.msk [vmem:[#allocation2] sm:$0x3] %vm47_vm0, %v72_v26 }
  0x41   :  { %v78_v27 = vld [vmem:[#allocation2] sm:$0x3] }
  0x42   :  { %v79_v28 = vmul.f32 0.125, %v78_v27 }
  0x44   :  { %215 = vmatmul.mubr.msk.f32.vlgmr.msra.gmra.mrb[0].mxu0 %vm52_vm2, %v79_v28 }
 0x117   :  { %v160_v32 = vpop.f32.mrb[0].mxu0 }
 0x118   :  { %v161_v33 = vadd.f32 %v199_v31, %v160_v32  ;;  %v216_v34 = vpop.f32.mrb[1].mxu0 }
 0x11a   :  { %v167_v35 = vsel %vm166_vm4, %v161_v33, -inf }
 0x11b   :  { %v169_v36 = vsel %vm168_vm5, %v167_v35, -inf }
 0x11c   :  { %170 = vmax.xlane.f32.xlu0 %v169_v36 }
 0x1a9   :  { %v171_v37 = vpop.xlane.xlu0 %170 }
 0x1aa   :  { %v172_v38 = vsub.f32 %v167_v35, %v171_v37 }
 0x1ac   :  { %v173_v39 = vmul.f32 1.442695, %v172_v38 }
 0x1ae   :  { %231 = vpow2.f32 %v173_v39 }
 0x1b8   :  { %v232_v40 = vpop.eup %231 }
 0x1b9   :  { %v175_v41 = vsel %vm168_vm5, %v232_v40, 0.0 }
 0x1ba   :  { %176 = vadd.xlane.f32.xlu0 %v175_v41 }
 0x247   :  { %v177_v42 = vpop.xlane.xlu0 %176 }
 0x248   :  { %233 = vlog2.f32 %v177_v42 }
 0x252   :  { %v234_v43 = vpop.eup %233 }
 0x253   :  { %v179_v44 = vmul.f32 0.6931472, %v234_v43 }
 0x255   :  { %v180_v45 = vsub.f32 %v172_v38, %v179_v44 }
 0x257   :  { %182 = vst.msk [vmem:[#allocation8] sm:$0x3] %vm181_vm6, %v180_v45 }
 0x258   :  { %290 = shalt.err (!%p287_p6)
}
 0x259   :  { %s291_s15 = scalar_lea.hbm %s382_s3, 32 }
 0x25a   :  { %p292_p7 = scmp.ne.s32.totalorder %s382_s3, %s291_s15  ;;  %p295_p8 = scmp.lt.u32.totalorder %s291_s15, %s382_s3 }
 0x25c   :  { %p297_p9 = pnand %p295_p8, %p292_p7 }
 0x25e   :  { %300 = shalt.err (!%p297_p9)
}
 0x25f   :  { %192 = dma.vmem_to_hbm [thread:$0]  %s190_s2, 32, %s382_s3, [#allocation5]  }
 0x260   :  { %305 = dma.done.wait [#allocation5], 32  }
 0x261   :  { %306 = vsyncadd [#allocation5], 4294967264 }
 0x262   :  { %196 = vsyncpa [#allocation4], 1 }
 0x263   :  { %197 = vsyncpa [#allocation7], 1 }
 0x264   :  { %198 = vsyncpa [#allocation5], 1 }

</bundles_post_ra>
